<compile_context>
chip_gen: v7x
topology: tpu7x:2x2x1
jax: 0.10.0
libtpu: 0.0.40
codegen_flags: <defaults>
</compile_context>

<pallas_src>
import functools

import jax
import jax.numpy as jnp
from jax import lax
from jax.experimental import pallas as pl
from jax.experimental.pallas import tpu as pltpu


def _dwconv_kernel(x_ref, wb_ref, o_ref, *, stride):
    """One (batch, channel-block) grid step: 3x3 depthwise conv + folded BN + ReLU.

    x_ref:  (1, tc, H, W)   input block in the caller dtype (W on the lane axis)
    wb_ref: (tc, 10, W)     f32; rows 0..8 = BN-scaled 3x3 taps (row-major i*3+j),
                            pre-broadcast along W; row 9 = folded BN bias
    o_ref:  (1, tc, Ho, Wo) output block in the caller dtype
    """
    x = x_ref[0]                                    # (tc, H, W), input dtype
    C, H, W = x.shape
    Ho, Wo = o_ref.shape[2], o_ref.shape[3]
    wb = wb_ref[...]                                # (tc, 10, W) f32

    # 1-pixel zero halo built directly on values (no HBM pad pass, no f32
    # scratch round trip).  Rows pad along sublanes; the three column taps are
    # lane-shifted copies of the row-padded block, kept in the input dtype.
    zrow = jnp.zeros((C, 1, W), x.dtype)
    xc = jnp.concatenate([zrow, x, zrow], axis=1)             # (C, H+2, W) -> j=1 tap
    zcol = jnp.zeros((C, H + 2, 1), x.dtype)
    xl = jnp.concatenate([zcol, xc[:, :, : W - 1]], axis=2)   # j=0 tap (col w-1)
    xr = jnp.concatenate([xc[:, :, 1:], zcol], axis=2)        # j=2 tap (col w+1)
    cols = (xl, xc, xr)

    # TODO(synk): for very long rows, accumulate in 8-row strips
    # (lax.fori_loop(..., unroll=True)) so `acc` stays register-resident.
    acc = jnp.zeros((C, Ho, W), jnp.float32)
    for i in range(3):
        row_hi = i + (Ho - 1) * stride + 1
        for j in range(3):
            if stride == 1:
                tap = cols[j][:, i:row_hi, :]                 # (C, Ho, W)
            else:
                tap = lax.slice(cols[j], (0, i, 0), (C, row_hi, W),
                                (1, stride, 1))               # strided sublane rows
            k = 3 * i + j
            acc = acc + tap * wb[:, k:k + 1, :]               # f32 accumulate

    if stride > 1:
        # Column subsample once at the end with a 0/1 selection matmul on the
        # (otherwise idle) MXU -- avoids lane-strided slices.
        # TODO(synk): de-interleave even/odd columns up front instead.
        iw = lax.broadcasted_iota(jnp.int32, (W, Wo), 0)
        io = lax.broadcasted_iota(jnp.int32, (W, Wo), 1)
        sel = (iw == stride * io).astype(jnp.float32)
        acc = jnp.dot(acc.reshape(C * Ho, W), sel,
                      preferred_element_type=jnp.float32).reshape(C, Ho, Wo)

    y = jnp.maximum(acc + wb[:, 9:10, :Wo], 0.0)
    o_ref[0] = y.astype(o_ref.dtype)


def _vmem_budgets():
    """Per-generation VMEM budgets (v7x has 64 MiB physical vs 128 MiB on v5e/v6e)."""
    cap = 64 * 1024 * 1024
    try:
        cap = int(getattr(pltpu.get_tpu_info(), "vmem_capacity_bytes", cap))
    except Exception:
        pass
    tile_budget = min(cap // 4, 24 * 1024 * 1024)   # user blocks per grid step
    vmem_limit = min(cap // 2, 64 * 1024 * 1024)    # scoped VMEM limit
    return tile_budget, vmem_limit


def _pick_channel_block(C, H, W, Ho, Wo, in_bytes, out_bytes, n_batch, tile_budget):
    """Largest channel block whose per-step VMEM footprint fits the budget,
    forcing >= 2 grid steps when possible (feeds both v7x TensorCores and gives
    the BlockSpec pipeline something to overlap)."""
    halo = (H + 2) * W
    per_ch = (2 * H * W * in_bytes        # double-buffered input block
              + 2 * Ho * Wo * out_bytes   # double-buffered output block
              + 4 * halo * in_bytes       # x + 3 halo/column-shifted copies
              + 4 * Ho * W * 4            # f32 accumulator + temporaries
              + 10 * W * 4)               # folded weight/bias block
    divisors = [d for d in range(1, C + 1) if C % d == 0]
    fitting = [d for d in divisors if d * per_ch <= tile_budget] or [1]
    tc = max(fitting)
    if n_batch * (C // tc) < 2:
        halved = [d for d in fitting if C // d >= 2]
        if halved:
            tc = max(halved)
    return tc


def dwconv_bn_relu(x_nchw, weight_oihw, gamma, beta, running_mean, running_var,
                   *, stride=1, eps=1e-5, channel_block=None):
    """Depthwise Conv2d(k=3, pad=1, groups=Cin, bias=False) + BatchNorm2d(eval) + ReLU.

    x_nchw:      (N, Cin, H, W)   -- stays NCHW end to end (no wrapper transposes)
    weight_oihw: (Cout, 1, 3, 3)  with Cout = Cin * multiplier
    returns:     (N, Cout, Ho, Wo) in x_nchw.dtype
    """
    N, Cin, H, W = x_nchw.shape
    Cout = weight_oihw.shape[0]
    assert Cout % Cin == 0
    mult = Cout // Cin
    Ho = (H + 2 - 3) // stride + 1
    Wo = (W + 2 - 3) // stride + 1
    out_dtype = x_nchw.dtype

    if mult > 1:
        # TODO(synk): express the depthwise multiplier through the channel
        # index_map (input block c -> c // mult) instead of an HBM repeat;
        # FSCNN always uses Cout == Cin so this path is cold.
        x_nchw = jnp.repeat(x_nchw, mult, axis=1)

    # Fold BN (inference) into the conv: w' = w * gamma/sqrt(var+eps),
    # b' = beta - mean * gamma/sqrt(var+eps).  Taps + bias are pre-broadcast
    # along W so the kernel's per-channel scalars become plain sublane
    # broadcasts.
    # TODO(synk): PyTorch BatchNorm2d in train() mode uses batch statistics;
    # this implements inference-mode (running-stats) BN only.
    scale = gamma.astype(jnp.float32) / jnp.sqrt(running_var.astype(jnp.float32) + eps)
    bias = beta.astype(jnp.float32) - running_mean.astype(jnp.float32) * scale
    w9 = (weight_oihw[:, 0].astype(jnp.float32) * scale[:, None, None]).reshape(Cout, 9)
    wb = jnp.concatenate([w9, bias[:, None]], axis=1)              # (Cout, 10) f32
    wb = jnp.broadcast_to(wb[:, :, None], (Cout, 10, W))

    tile_budget, vmem_limit = _vmem_budgets()
    in_bytes = jnp.dtype(x_nchw.dtype).itemsize
    out_bytes = jnp.dtype(out_dtype).itemsize
    tc = channel_block if channel_block is not None else _pick_channel_block(
        Cout, H, W, Ho, Wo, in_bytes, out_bytes, N, tile_budget)
    assert Cout % tc == 0, (Cout, tc)
    n_cblk = Cout // tc

    kernel = functools.partial(_dwconv_kernel, stride=stride)

    return pl.pallas_call(
        kernel,
        out_shape=jax.ShapeDtypeStruct((N, Cout, Ho, Wo), out_dtype),
        grid_spec=pltpu.PrefetchScalarGridSpec(
            num_scalar_prefetch=0,
            grid=(N, n_cblk),
            in_specs=[
                pl.BlockSpec((1, tc, H, W), lambda n, c: (n, c, 0, 0)),
                pl.BlockSpec((tc, 10, W), lambda n, c: (c, 0, 0)),
            ],
            out_specs=pl.BlockSpec((1, tc, Ho, Wo), lambda n, c: (n, c, 0, 0)),
        ),
        compiler_params=pltpu.CompilerParams(
            dimension_semantics=("parallel", "parallel"),
            vmem_limit_bytes=vmem_limit,
        ),
    )(x_nchw, wb)


def _reference(x_nchw, weight_oihw, gamma, beta, mean, var, *, stride=1, eps=1e-5):
    Cin = x_nchw.shape[1]
    y = lax.conv_general_dilated(
        x_nchw.astype(jnp.float32), weight_oihw.astype(jnp.float32),
        window_strides=(stride, stride), padding=((1, 1), (1, 1)),
        feature_group_count=Cin,
        dimension_numbers=("NCHW", "OIHW", "NCHW"))
    scale = (gamma / jnp.sqrt(var + eps)).reshape(1, -1, 1, 1)
    bias = (beta - mean * gamma / jnp.sqrt(var + eps)).reshape(1, -1, 1, 1)
    return jnp.maximum(y * scale + bias, 0.0)


def _make_params(key, N, C, H, W):
    k1, k2, k3, k4, k5, k6 = jax.random.split(key, 6)
    x = jax.random.normal(k1, (N, C, H, W), jnp.float32)
    weight = jax.random.normal(k2, (C, 1, 3, 3), jnp.float32) * 0.2
    gamma = jax.random.uniform(k3, (C,), jnp.float32, 0.5, 1.5)
    beta = jax.random.normal(k4, (C,), jnp.float32) * 0.1
    mean = jax.random.normal(k5, (C,), jnp.float32) * 0.1
    var = jax.random.uniform(k6, (C,), jnp.float32, 0.5, 1.5)
    return x, weight, gamma, beta, mean, var


if __name__ == "__main__":
    key = jax.random.PRNGKey(0)
    k1, k2 = jax.random.split(key)

    # 1) Small f32 case at the module's typical depthwise setting (Cout == Cin).
    x, w, g, b, m, v = _make_params(k1, 2, 4, 16, 16)
    out = jax.block_until_ready(dwconv_bn_relu(x, w, g, b, m, v, stride=1))
    ref = _reference(x, w, g, b, m, v, stride=1)
    assert out.shape == (2, 4, 16, 16) and out.dtype == jnp.float32
    assert jnp.allclose(out, ref, atol=1e-4, rtol=1e-4), float(
        jnp.max(jnp.abs(out - ref)))

    # 2) bf16 I/O path (bf16 in -> bf16 out, f32 accumulation inside the kernel).
    x16 = x.astype(jnp.bfloat16)
    out16 = jax.block_until_ready(dwconv_bn_relu(x16, w, g, b, m, v))
    ref16 = _reference(x16.astype(jnp.float32), w, g, b, m, v)
    assert out16.dtype == jnp.bfloat16
    assert jnp.allclose(out16.astype(jnp.float32), ref16, atol=5e-2, rtol=5e-2)

    # 3) Channel-blocked grid: auto tiling forces >= 2 channel blocks for N == 1.
    xb, wb_, gb, bb, mb, vb = _make_params(k2, 1, 64, 16, 16)
    outb = jax.block_until_ready(dwconv_bn_relu(xb, wb_, gb, bb, mb, vb))
    refb = _reference(xb, wb_, gb, bb, mb, vb)
    assert outb.shape == (1, 64, 16, 16)
    assert jnp.allclose(outb, refb, atol=1e-4, rtol=1e-4), float(
        jnp.max(jnp.abs(outb - refb)))

    # 4) Explicit small channel block (grid = (1, 4)) on the same data.
    outb4 = jax.block_until_ready(
        dwconv_bn_relu(xb, wb_, gb, bb, mb, vb, channel_block=16))
    assert jnp.allclose(outb4, refb, atol=1e-4, rtol=1e-4)

    print("KERNEL_OK")
</pallas_src>

<mosaic_0001>
module attributes {stable_mosaic.version = 11 : i64} {
  func.func @_dwconv_kernel(%arg0: i32, %arg1: i32, %arg2: memref<1x4x16x16xf32, #tpu.memory_space<vmem>>, %arg3: memref<4x10x16xf32, #tpu.memory_space<vmem>>, %arg4: memref<1x4x16x16xf32, #tpu.memory_space<vmem>>) attributes {dimension_semantics = [#tpu.dimension_semantics<parallel>, #tpu.dimension_semantics<parallel>], iteration_bounds = array<i64: 2, 1>, scalar_prefetch = 0 : i64, scratch_operands = 0 : i64, tpu.core_type = #tpu.core_type<tc>, window_params = [{transform_indices = @transform_0, window_bounds = array<i64: 1, 4, 16, 16>}, {transform_indices = @transform_1, window_bounds = array<i64: 4, 10, 16>}, {transform_indices = @transform_2, window_bounds = array<i64: 1, 4, 16, 16>}]} {
    %c0 = arith.constant 0 : index
    %c0_0 = arith.constant 0 : index
    %c0_1 = arith.constant 0 : index
    %c0_2 = arith.constant 0 : index
    %0 = vector.load %arg2[%c0, %c0_0, %c0_1, %c0_2] : memref<1x4x16x16xf32, #tpu.memory_space<vmem>>, vector<1x4x16x16xf32>
    %1 = vector.shape_cast %0 : vector<1x4x16x16xf32> to vector<4x16x16xf32>
    %c0_3 = arith.constant 0 : index
    %c0_4 = arith.constant 0 : index
    %c0_5 = arith.constant 0 : index
    %2 = vector.load %arg3[%c0_3, %c0_4, %c0_5] : memref<4x10x16xf32, #tpu.memory_space<vmem>>, vector<4x10x16xf32>
    %cst = arith.constant 0.000000e+00 : f32
    %3 = vector.broadcast %cst : f32 to vector<4x1x16xf32>
    %4 = tpu.concatenate %3, %1, %3 in 1 : vector<4x1x16xf32>, vector<4x16x16xf32>, vector<4x1x16xf32> -> vector<4x18x16xf32>
    %cst_6 = arith.constant 0.000000e+00 : f32
    %5 = vector.broadcast %cst_6 : f32 to vector<4x18x1xf32>
    %6 = vector.extract_strided_slice %4 {offsets = [0, 0, 0], sizes = [4, 18, 15], strides = [1, 1, 1]} : vector<4x18x16xf32> to vector<4x18x15xf32>
    %7 = tpu.concatenate %5, %6 in 2 : vector<4x18x1xf32>, vector<4x18x15xf32> -> vector<4x18x16xf32>
    %8 = vector.extract_strided_slice %4 {offsets = [0, 0, 1], sizes = [4, 18, 15], strides = [1, 1, 1]} : vector<4x18x16xf32> to vector<4x18x15xf32>
    %9 = tpu.concatenate %8, %5 in 2 : vector<4x18x15xf32>, vector<4x18x1xf32> -> vector<4x18x16xf32>
    %cst_7 = arith.constant 0.000000e+00 : f32
    %10 = vector.broadcast %cst_7 : f32 to vector<4x16x16xf32>
    %11 = vector.extract_strided_slice %7 {offsets = [0, 0, 0], sizes = [4, 16, 16], strides = [1, 1, 1]} : vector<4x18x16xf32> to vector<4x16x16xf32>
    %12 = vector.extract_strided_slice %2 {offsets = [0, 0, 0], sizes = [4, 1, 16], strides = [1, 1, 1]} : vector<4x10x16xf32> to vector<4x1x16xf32>
    %13 = vector.broadcast %12 : vector<4x1x16xf32> to vector<4x16x16xf32>
    %14 = arith.mulf %11, %13 : vector<4x16x16xf32>
    %15 = arith.addf %10, %14 : vector<4x16x16xf32>
    %16 = vector.extract_strided_slice %4 {offsets = [0, 0, 0], sizes = [4, 16, 16], strides = [1, 1, 1]} : vector<4x18x16xf32> to vector<4x16x16xf32>
    %17 = vector.extract_strided_slice %2 {offsets = [0, 1, 0], sizes = [4, 1, 16], strides = [1, 1, 1]} : vector<4x10x16xf32> to vector<4x1x16xf32>
    %18 = vector.broadcast %17 : vector<4x1x16xf32> to vector<4x16x16xf32>
    %19 = arith.mulf %16, %18 : vector<4x16x16xf32>
    %20 = arith.addf %15, %19 : vector<4x16x16xf32>
    %21 = vector.extract_strided_slice %9 {offsets = [0, 0, 0], sizes = [4, 16, 16], strides = [1, 1, 1]} : vector<4x18x16xf32> to vector<4x16x16xf32>
    %22 = vector.extract_strided_slice %2 {offsets = [0, 2, 0], sizes = [4, 1, 16], strides = [1, 1, 1]} : vector<4x10x16xf32> to vector<4x1x16xf32>
    %23 = vector.broadcast %22 : vector<4x1x16xf32> to vector<4x16x16xf32>
    %24 = arith.mulf %21, %23 : vector<4x16x16xf32>
    %25 = arith.addf %20, %24 : vector<4x16x16xf32>
    %26 = vector.extract_strided_slice %7 {offsets = [0, 1, 0], sizes = [4, 16, 16], strides = [1, 1, 1]} : vector<4x18x16xf32> to vector<4x16x16xf32>
    %27 = vector.extract_strided_slice %2 {offsets = [0, 3, 0], sizes = [4, 1, 16], strides = [1, 1, 1]} : vector<4x10x16xf32> to vector<4x1x16xf32>
    %28 = vector.broadcast %27 : vector<4x1x16xf32> to vector<4x16x16xf32>
    %29 = arith.mulf %26, %28 : vector<4x16x16xf32>
    %30 = arith.addf %25, %29 : vector<4x16x16xf32>
    %31 = vector.extract_strided_slice %4 {offsets = [0, 1, 0], sizes = [4, 16, 16], strides = [1, 1, 1]} : vector<4x18x16xf32> to vector<4x16x16xf32>
    %32 = vector.extract_strided_slice %2 {offsets = [0, 4, 0], sizes = [4, 1, 16], strides = [1, 1, 1]} : vector<4x10x16xf32> to vector<4x1x16xf32>
    %33 = vector.broadcast %32 : vector<4x1x16xf32> to vector<4x16x16xf32>
    %34 = arith.mulf %31, %33 : vector<4x16x16xf32>
    %35 = arith.addf %30, %34 : vector<4x16x16xf32>
    %36 = vector.extract_strided_slice %9 {offsets = [0, 1, 0], sizes = [4, 16, 16], strides = [1, 1, 1]} : vector<4x18x16xf32> to vector<4x16x16xf32>
    %37 = vector.extract_strided_slice %2 {offsets = [0, 5, 0], sizes = [4, 1, 16], strides = [1, 1, 1]} : vector<4x10x16xf32> to vector<4x1x16xf32>
    %38 = vector.broadcast %37 : vector<4x1x16xf32> to vector<4x16x16xf32>
    %39 = arith.mulf %36, %38 : vector<4x16x16xf32>
    %40 = arith.addf %35, %39 : vector<4x16x16xf32>
    %41 = vector.extract_strided_slice %7 {offsets = [0, 2, 0], sizes = [4, 16, 16], strides = [1, 1, 1]} : vector<4x18x16xf32> to vector<4x16x16xf32>
    %42 = vector.extract_strided_slice %2 {offsets = [0, 6, 0], sizes = [4, 1, 16], strides = [1, 1, 1]} : vector<4x10x16xf32> to vector<4x1x16xf32>
    %43 = vector.broadcast %42 : vector<4x1x16xf32> to vector<4x16x16xf32>
    %44 = arith.mulf %41, %43 : vector<4x16x16xf32>
    %45 = arith.addf %40, %44 : vector<4x16x16xf32>
    %46 = vector.extract_strided_slice %4 {offsets = [0, 2, 0], sizes = [4, 16, 16], strides = [1, 1, 1]} : vector<4x18x16xf32> to vector<4x16x16xf32>
    %47 = vector.extract_strided_slice %2 {offsets = [0, 7, 0], sizes = [4, 1, 16], strides = [1, 1, 1]} : vector<4x10x16xf32> to vector<4x1x16xf32>
    %48 = vector.broadcast %47 : vector<4x1x16xf32> to vector<4x16x16xf32>
    %49 = arith.mulf %46, %48 : vector<4x16x16xf32>
    %50 = arith.addf %45, %49 : vector<4x16x16xf32>
    %51 = vector.extract_strided_slice %9 {offsets = [0, 2, 0], sizes = [4, 16, 16], strides = [1, 1, 1]} : vector<4x18x16xf32> to vector<4x16x16xf32>
    %52 = vector.extract_strided_slice %2 {offsets = [0, 8, 0], sizes = [4, 1, 16], strides = [1, 1, 1]} : vector<4x10x16xf32> to vector<4x1x16xf32>
    %53 = vector.broadcast %52 : vector<4x1x16xf32> to vector<4x16x16xf32>
    %54 = arith.mulf %51, %53 : vector<4x16x16xf32>
    %55 = arith.addf %50, %54 : vector<4x16x16xf32>
    %56 = vector.extract_strided_slice %2 {offsets = [0, 9, 0], sizes = [4, 1, 16], strides = [1, 1, 1]} : vector<4x10x16xf32> to vector<4x1x16xf32>
    %57 = vector.broadcast %56 : vector<4x1x16xf32> to vector<4x16x16xf32>
    %58 = arith.addf %55, %57 : vector<4x16x16xf32>
    %cst_8 = arith.constant 0.000000e+00 : f32
    %59 = vector.broadcast %cst_8 : f32 to vector<4x16x16xf32>
    %60 = arith.maximumf %58, %59 : vector<4x16x16xf32>
    %c0_9 = arith.constant 0 : index
    %c0_10 = arith.constant 0 : index
    %c0_11 = arith.constant 0 : index
    %c0_12 = arith.constant 0 : index
    %61 = vector.load %arg4[%c0_9, %c0_10, %c0_11, %c0_12] : memref<1x4x16x16xf32, #tpu.memory_space<vmem>>, vector<1x4x16x16xf32>
    %62 = vector.shape_cast %61 : vector<1x4x16x16xf32> to vector<4x16x16xf32>
    %63 = vector.shape_cast %60 : vector<4x16x16xf32> to vector<1x4x16x16xf32>
    tpu.vector_store %arg4[%c0_9, %c0_10, %c0_11, %c0_12], %63 {strides = array<i32>} : memref<1x4x16x16xf32, #tpu.memory_space<vmem>>, vector<1x4x16x16xf32>,
    return
  }
  func.func @transform_0(%arg0: i32, %arg1: i32) -> (i32, i32, i32, i32) {
    %c0_i32 = arith.constant 0 : i32
    %c0_i32_0 = arith.constant 0 : i32
    %c0_i32_1 = arith.constant 0 : i32
    return %arg0, %arg1, %c0_i32, %c0_i32_0 : i32, i32, i32, i32
  }
  func.func @transform_1(%arg0: i32, %arg1: i32) -> (i32, i32, i32) {
    %c0_i32 = arith.constant 0 : i32
    %c0_i32_0 = arith.constant 0 : i32
    %c0_i32_1 = arith.constant 0 : i32
    return %arg1, %c0_i32, %c0_i32_0 : i32, i32, i32
  }
  func.func @transform_2(%arg0: i32, %arg1: i32) -> (i32, i32, i32, i32) {
    %c0_i32 = arith.constant 0 : i32
    %c0_i32_0 = arith.constant 0 : i32
    %c0_i32_1 = arith.constant 0 : i32
    return %arg0, %arg1, %c0_i32, %c0_i32_0 : i32, i32, i32, i32
  }
}

</mosaic_0001>

<bundles_post_ra>
// kernel: tpu_custom_call.1
= control target key start
LH: loop header
LB: loop body
LE: loop exit
PB: predicated region body
PF: predicated region fallthrough
CT: control target
= control target key end

     0   :  { %7 = vsyncpa [#allocation3], 0  ;;  %s2151_s0 = inlined_call_operand.hbm [shape: f32[2,4,16,16], index: 0, kind: input, shape index: {}]   ;;  %s2152_s1 = inlined_call_operand.vmem [shape: f32[4,10,16], index: 1, kind: input, shape index: {}]   ;;  %s2153_s2 = inlined_call_operand.hbm [shape: f32[2,4,16,16], index: 2, kind: output, shape index: {}]  }
   0x1   :  { %9 = vsyncpa [#allocation3 + $0x1], 0 }
   0x2   :  { %10 = vsyncpa [#allocation4], 0 }
   0x3   :  { %12 = vsyncpa [#allocation4 + $0x1], 0  ;;  %s1308_s9 = smov 0   ;;  %s1310_s10 = smov 0  }
   0x4   :  { %s1312_s11 = smov 0   ;;  %s1314_s12 = smov 0  }
   0x5   :  { %s1316_s13 = smov 0   ;;  %s1318_s14 = smov 0  }
   0x6 LB: > { %s1085_s15 = sadd.s32 4294967295, %s1283_s14   ;;  %s1086_s16 = sadd.s32 4294967294, %s1283_s14   ;;  %s1283_s14 = sphi %s1318_s14, %s18_s14   ;;  %s1279_s13 = sphi %s1316_s13, %s2220_s13   ;;  %s1275_s12 = sphi %s1314_s12, %s2219_s12   ;;  %s1271_s11 = sphi %s1312_s11, %s2218_s11   ;;  %s1267_s10 = sphi %s1310_s10, %s2217_s10   ;;  %s1263_s9 = sphi %s1308_s9, %s2216_s9  }
   0x7   : > { %s30_s17 = sadd.s32 1, %s1279_s13  ;;  %s39_s18 = sadd.s32 1, %s1271_s11 }
   0x8   : > { %p32_p0 = scmp.ge.s32.totalorder %s30_s17, 2  ;;  %p46_p1 = scmp.ne.s32.totalorder %s1271_s11, %s1267_s10 }
   0x9   : > { %p47_p2 = scmp.eq.s32.totalorder %s1283_s14, 0  ;;  %p52_p3 = scmp.ne.s32.totalorder %s1267_s10, %s1263_s9 }
   0xa   : > { %s2222_s17 = smov (%p32_p0, %s30_s17), 0  ;;  %p53_p5 = scmp.eq.s32.totalorder %s1085_s15, 0 }
   0xb   : > { %p1349_p4 = por %p47_p2, %p46_p1  ;;  %s34_s20 = ssub.s32 %s1279_s13, %s2222_s17 }
   0xc   : > { %p104_p6 = scmp.eq.s32.totalorder %s1085_s15, 1  ;;  %p37_p7 = scmp.eq.s32.totalorder %s34_s20, 0 }
   0xd   : > { %p1355_p8 = por %p53_p5, %p52_p3  ;;  %p110_p10 = scmp.eq.s32.totalorder %s1086_s16, 1 }
   0xe   : > { %p1359_p9 = por %p104_p6, %p46_p1  ;;  %p1115_p13 = scmp.lt.s32.totalorder %s1283_s14, 2 }
   0xf   : > { %s1364_s23 = scalar_select %p37_p7, %s1271_s11, %s39_s18  }
  0x10   : > { %s2165_s22 = scalar_select %p1359_p9, 1, 0 }
  0x11   : > { %p1366_p11 = por %p110_p10, %p52_p3  ;;  %s140_s25 = sand.u32 1, %s1271_s11  }
  0x12   : > { %s1090_s26 = sshll.u32 %s140_s25, 6  ;;  %s1101_s27 = sshll.u32 %s1279_s13, 10 }
  0x13   : > { %s2166_s24 = scalar_select %p1366_p11, 1, 0 }
  0x14   : > { %s1377_s30 = scalar_lea.hbm %s2151_s0, %s1101_s27  ;;  %s144_s3 = scalar_lea.vmem [#allocation2], %s1090_s26 }
  0x15   : > { %s154_s4 = sshll.u32 %s144_s3, 4  ;;  %p1383_p0 = pnand %p1115_p13, %p1349_p4  ;;  %s1379_s4 = int_to_ptr.vmem [resolvable:$true] %s154_s4 }
  0x16   : > { %s1388_s6 = scalar_lea.sflag [#allocation3], %s140_s25  ;;  %s1171_s7 = scalar_lea.hbm %s1377_s30, 1024 }
  0x17   : > { %p1172_p2 = scmp.ne.s32.totalorder %s1377_s30, %s1171_s7  ;;  %p1173_p3 = pneg %p1383_p0 }
  0x18   : > { %s1176_s16 = scalar_lea.hbm %s2151_s0, 2048  ;;  %p1177_p4 = scmp.lt.u32.totalorder %s1377_s30, %s2151_s0 }
  0x19   : > { %p1174_p5 = pnand %p1173_p3, %p1172_p2  ;;  %p1178_p7 = scmp.lt.u32.totalorder %s1176_s16, %s1171_s7 }
  0x1a   : > { %p1180_p13 = scmp.lt.u32.totalorder %s1171_s7, %s1377_s30 }
  0x1b   : > { %p1175_p6 = pneg %p1174_p5  ;;  %p1179_p10 = por %p1178_p7, %p1177_p4 }
  0x1d   : > { %p1181_p12 = por %p1180_p13, %p1179_p10 }
  0x1f   : > { %p1182_p1 = pnand %p1181_p12, %p1175_p6 }
  0x21   : > { %1185 = shalt.err (!%p1182_p1)
}
  0x22   : > { %s1186_s20 = scalar_lea.vmem %s1379_s4, 1024  ;;  %s1285_s25 = smov [#allocation2]  }
  0x23   : > { %p1187_p2 = scmp.ne.s32.totalorder %s1379_s4, %s1186_s20  ;;  %s1191_s26 = sshll.u32 %s1285_s25, 4  ;;  %s1192_s26 = int_to_ptr.vmem [resolvable:$false] %s1191_s26 }
  0x24   : > { %s1193_s27 = scalar_lea.vmem %s1192_s26, 2048  ;;  %p1194_p9 = scmp.lt.s32.totalorder %s1379_s4, %s1192_s26 }
  0x25   : > { %p1189_p5 = pnand %p1187_p2, %p1173_p3  ;;  %p1195_p4 = scmp.lt.s32.totalorder %s1193_s27, %s1186_s20 }
  0x27   : > { %p1190_p11 = pneg %p1189_p5  ;;  %p1196_p7 = por %p1195_p4, %p1194_p9 }
  0x29   : > { %p1197_p10 = pnand %p1196_p7, %p1190_p11 }
  0x2b   : > { %1200 = shalt.err (!%p1197_p10)
}
  0x2c   : > { %s1286_s28 = smov 128   ;;  %s1287_s29 = smov 8  }
  0x2d   : > { %1110 = dma.hbm_to_vmem [thread:$0]  (!%p1383_p0), %s1377_s30, 1024, %s1379_s4, %s1388_s6, %s1286_s28, %s1286_s28, %s1287_s29  }
  0x2e   : > { %p162_p12 = scmp.lt.s32.totalorder %s1283_s14, 3  ;;  %p2168_p1 = scmp.ge.s32.totalorder %s1283_s14, 1 }
  0x30   : > { %p163_p3 = pnand %p2168_p1, %p162_p12 }
  0x32   : > { %166 = sbr.rel (%p163_p3) target bundleno = 267 (0x10b), region = 28 }
  0x39   : > { %s1420_s3 = sand.u32 1, %s1267_s10  }
  0x3a   : > { %s1094_s7 = sshll.u32 %s1420_s3, 6  ;;  %s169_s8 = scalar_lea.sflag [#allocation3], %s1420_s3 }
  0x3b   : > { %s172_s15 = scalar_lea.vmem [#allocation2], %s1094_s7 }
  0x3c   : > { %1254 = dma.done.wait (%p1355_p8), %s169_s8, 1024  }
  0x3d   : > { %1256 = vsyncadd (%p1355_p8), %s169_s8, 4294966272  ;;  %v210_v0 = vld [vmem:[%s172_s15 + $0x10] sm:$0xff]  ;;  %vm232_vm0 = vcmask 1040384   ;;  %v208_v1 = vld [vmem:[%s172_s15] sm:$0xff]  ;;  %v371_v12 = vlaneseq  ;;  %s1288_s21 = smov 1   ;;  %vm507_vm1 = vcmask 1046528  }
  0x3e   : > { %v236_v2 = vrot.slane %v210_v0, 7  ;;  %v233_v3 = vrot.slane %v208_v1, 7  ;;  %v211_v4 = vld [vmem:[%s172_s15 + $0x18] sm:$0xff]  ;;  %v209_v5 = vld [vmem:[%s172_s15 + $0x8] sm:$0xff]  ;;  %v212_v8 = vld [vmem:[%s172_s15 + $0x20] sm:$0xff]  ;;  %vm736_vm2 = vcmask 1045504  }
  0x3f   : > { %v237_v6 = vrot.slane %v211_v4, 7  ;;  %v234_v7 = vrot.slane %v209_v5, 7  ;;  %v213_v9 = vld [vmem:[%s172_s15 + $0x28] sm:$0xff]  ;;  %v239_v15 = vrot.slane %v212_v8, 7  ;;  %v214_v17 = vld [vmem:[%s172_s15 + $0x30] sm:$0xff]  ;;  %v215_v18 = vld [vmem:[%s172_s15 + $0x38] sm:$0xff] }
  0x40   : > { %v1431_v10 = vsel %vm232_vm0, 0.0, %v236_v2  ;;  %v1434_v11 = vsel %vm232_vm0, 0.0, %v233_v3  ;;  %v240_v16 = vrot.slane %v213_v9, 7  ;;  %v1446_v19 = vshrl.u32 %v371_v12, 7  ;;  %v1475_v28 = vld [vmem:[%s2152_s1] sm:$0xff]  ;;  %v1481_v30 = vld [vmem:[%s2152_s1 + $0x10] sm:$0xff] }
  0x41   : > { %279 = vrot.lane.b32.xlu1 %v1431_v10, %s1288_s21  ;;  %273 = vrot.lane.b32.xlu0 %v1434_v11, %s1288_s21  ;;  %v1441_v13 = vsel %vm232_vm0, %v236_v2, %v237_v6  ;;  %v1444_v14 = vsel %vm232_vm0, %v233_v3, %v234_v7  ;;  %v1456_v21 = vsel %vm232_vm0, 0.0, %v239_v15  ;;  %v242_v22 = vrot.slane %v214_v17, 7  ;;  %v1515_v41 = vld [vmem:[%s2152_s1 + $0x20] sm:$0xff]  ;;  %v1536_v54 = vld [vmem:[%s2152_s1 + $0x30] sm:$0xff]  ;;  %s1289_s25 = smov 127   ;;  %s2008_s4 = scalar_lea.vmem [#allocation5], %s1094_s7 }
  0x42   : > { %v1453_v20 = vsel %vm232_vm0, %v239_v15, %v240_v16  ;;  %v243_v23 = vrot.slane %v215_v18, 7  ;;  %v546_v24 = vsub.s32 4, %v1446_v19  ;;  %v1460_v25 = vsub.s32 7, %v1446_v19  ;;  %s1102_s7 = sshll.u32 %s1275_s12, 10  ;;  %s983_s5 = sshll.u32 %s2008_s4, 4  ;;  %s2098_s5 = int_to_ptr.vmem [resolvable:$true] %s983_s5 }
  0x43   : > { %v1470_v27 = vsel %vm232_vm0, 0.0, %v242_v22  ;;  %v1493_v33 = vsel %vm232_vm0, %v237_v6, 0.0  ;;  %v1496_v34 = vsel %vm232_vm0, %v234_v7, 0.0  ;;  %v1522_v44 = vsel %vm232_vm0, %v240_v16, 0.0  ;;  %s2096_s18 = scalar_lea.hbm %s2153_s2, %s1102_s7  ;;  %s967_s12 = scalar_lea.sflag [#allocation4], %s1420_s3 }
  0x44   : > { %v1467_v26 = vsel %vm232_vm0, %v242_v22, %v243_v23  ;;  %v547_v29 = vrot.slane %v1475_v28, %v546_v24  ;;  %v1485_v31 = vrot.slane %v1475_v28, %v1460_v25  ;;  %v551_v32 = vrot.slane %v1481_v30, %v546_v24  ;;  %s1201_s19 = scalar_lea.vmem %s2098_s5, 1024  ;;  %p2213_p9 = scmp.ne.s32.totalorder %s2165_s22, 0 }
  0x45   : > { %281 = vrot.lane.b32.xlu1 %v1441_v13, %s1288_s21  ;;  %275 = vrot.lane.b32.xlu0 %v1444_v14, %s1288_s21  ;;  %v1519_v43 = vsel %vm232_vm0, %v243_v23, 0.0  ;;  %v555_v45 = vrot.slane %v1515_v41, %v546_v24  ;;  %v780_v52 = vrot.slane %v1481_v30, %v1460_v25  ;;  %v559_v58 = vrot.slane %v1536_v54, %v546_v24  ;;  %p1202_p8 = scmp.ne.s32.totalorder %s2098_s5, %s1201_s19  ;;  %s1290_s20 = smov [#allocation5]  }
  0x46   : > { %v561_v35 = vmul.f32 %v547_v29, %v1444_v14  ;;  %v562_v36 = vmul.f32 %v547_v29, %v1496_v34  ;;  %v560_v37 = vmul.f32 %v547_v29, %v1434_v11  ;;  %v789_v38 = vmul.f32 %v1485_v31, %v1434_v11 }
  0x47   : > { %v1505_v39 = vmul.f32 %v1485_v31, %v1444_v14  ;;  %v564_v40 = vmul.f32 %v551_v32, %v1441_v13  ;;  %v565_v42 = vmul.f32 %v551_v32, %v1493_v33  ;;  %v563_v46 = vmul.f32 %v551_v32, %v1431_v10  ;;  %p1203_p11 = pnand %p1202_p8, %p2213_p9 }
  0x48   : > { %v585_v47 = vrot.slane %v561_v35, 1  ;;  %v587_v48 = vrot.slane %v562_v36, 1  ;;  %v584_v49 = vrot.slane %v560_v37, 1  ;;  %v813_v50 = vrot.slane %v789_v38, 2 }
  0x49   : > { %287 = vrot.lane.b32.xlu1 %v1453_v20, %s1288_s21  ;;  %285 = vrot.lane.b32.xlu0 %v1456_v21, %s1288_s21  ;;  %v814_v51 = vrot.slane %v1505_v39, 2  ;;  %v590_v53 = vrot.slane %v564_v40, 1  ;;  %v592_v55 = vrot.slane %v565_v42, 1  ;;  %v567_v56 = vmul.f32 %v555_v45, %v1453_v20  ;;  %p1204_p0 = pneg %p1203_p11 }
  0x4a   : > { %v566_v57 = vmul.f32 %v555_v45, %v1456_v21  ;;  %v589_v59 = vrot.slane %v563_v46, 1  ;;  %v568_v60 = vmul.f32 %v555_v45, %v1522_v44  ;;  %v1543_v61 = vsel %vm507_vm1, %v585_v47, %v587_v48 }
  0x4b   : > { %v784_v62 = vrot.slane %v1515_v41, %v1460_v25  ;;  %v1552_v63 = vsel %vm507_vm1, %v584_v49, %v585_v47  ;;  %v1557_v0 = vsel %vm736_vm2, %v813_v50, %v814_v51  ;;  %v792_v1 = vmul.f32 %v780_v52, %v1431_v10 }
  0x4c   : > { %v793_v2 = vmul.f32 %v780_v52, %v1441_v13  ;;  %v1562_v3 = vsel %vm507_vm1, %v590_v53, %v592_v55  ;;  %v595_v4 = vrot.slane %v567_v56, 1  ;;  %v594_v5 = vrot.slane %v566_v57, 1 }
  0x4d   : > { %293 = vrot.lane.b32.xlu1 %v1467_v26, %s1288_s21  ;;  %291 = vrot.lane.b32.xlu0 %v1470_v27, %s1288_s21  ;;  %v570_v6 = vmul.f32 %v559_v58, %v1467_v26  ;;  %v569_v7 = vmul.f32 %v559_v58, %v1470_v27  ;;  %v571_v8 = vmul.f32 %v559_v58, %v1519_v43  ;;  %v597_v9 = vrot.slane %v568_v60, 1 }
  0x4e   : > { %v1568_v12 = vsel %vm507_vm1, %v589_v59, %v590_v53  ;;  %v796_v15 = vmul.f32 %v784_v62, %v1453_v20  ;;  %v818_v16 = vrot.slane %v792_v1, 2  ;;  %v819_v17 = vrot.slane %v793_v2, 2 }
  0x4f   : > { %v795_v18 = vmul.f32 %v784_v62, %v1456_v21  ;;  %v788_v22 = vrot.slane %v1536_v54, %v1460_v25  ;;  %v600_v23 = vrot.slane %v570_v6, 1  ;;  %v599_v24 = vrot.slane %v569_v7, 1 }
  0x50   : > { %v602_v29 = vrot.slane %v571_v8, 1  ;;  %v1579_v32 = vsel %vm507_vm1, %v595_v4, %v597_v9  ;;  %v1582_v35 = vsel %vm507_vm1, %v594_v5, %v595_v4  ;;  %v824_v36 = vrot.slane %v796_v15, 2 }
  0x51   : > { %283 = vrot.lane.b32.xlu1 %v1493_v33, %s1288_s21  ;;  %277 = vrot.lane.b32.xlu0 %v1496_v34, %s1288_s21  ;;  %2169 = vst [vmem:[#allocation8_spill] sm:$0xff] %v1582_v35  ;;  %v823_v37 = vrot.slane %v795_v18, 2  ;;  %v799_v38 = vmul.f32 %v788_v22, %v1467_v26  ;;  %v798_v25 = vmul.f32 %v788_v22, %v1470_v27  ;;  %v698_v39 = vsub.s32 6, %v1446_v19 }
  0x52   : > { %v1591_v40 = vsel %vm736_vm2, %v818_v16, %v819_v17  ;;  %v1594_v42 = vsel %vm507_vm1, %v600_v23, %v602_v29  ;;  %v1597_v45 = vsel %vm507_vm1, %v599_v24, %v600_v23  ;;  %v794_v46 = vmul.f32 %v780_v52, %v1493_v33 }
  0x53   : > { %2170 = vst [vmem:[#allocation9_spill] sm:$0xff] %v1591_v40  ;;  %2171 = vst [vmem:[#allocation10_spill] sm:$0xff] %v1594_v42  ;;  %v791_v47 = vmul.f32 %v1485_v31, %v1496_v34  ;;  %v829_v48 = vrot.slane %v799_v38, 2  ;;  %v828_v49 = vrot.slane %v798_v25, 2  ;;  %v1607_v50 = vsel %vm736_vm2, %v823_v37, %v824_v36  ;;  %v219_v25 = vld [vmem:[%s2152_s1 + $0x18] sm:$0x3] }
  0x54   : > { %2172 = vst [vmem:[#allocation11_spill] sm:$0xff] %v1597_v45  ;;  %2173 = vst [vmem:[#allocation12_spill] sm:$0xff] %v1607_v50  ;;  %v821_v53 = vrot.slane %v794_v46, 2  ;;  %v800_v31 = vmul.f32 %v788_v22, %v1519_v43  ;;  %v797_v52 = vmul.f32 %v784_v62, %v1522_v44  ;;  %v469_v62 = vsub.s32 3, %v1446_v19 }
  0x55   : > { %295 = vrot.lane.b32.xlu1 %v1519_v43, %s1288_s21  ;;  %289 = vrot.lane.b32.xlu0 %v1522_v44, %s1288_s21  ;;  %v816_v55 = vrot.slane %v791_v47, 2  ;;  %v1616_v56 = vsel %vm736_vm2, %v828_v49, %v829_v48  ;;  %vm309_vm3 = vcmask 7168   ;;  %v1653_v5 = vrot.slane %v1481_v30, %v698_v39 }
  0x56   : > { %2174 = vst [vmem:[#allocation13_spill] sm:$0xff] %v1616_v56  ;;  %v1623_v57 = vsel %vm736_vm2, %v819_v17, %v821_v53  ;;  %v826_v58 = vrot.slane %v797_v52, 2  ;;  %v1650_v4 = vrot.slane %v1481_v30, %v469_v62  ;;  %v1659_v7 = vrot.slane %v1475_v28, %v469_v62  ;;  %v221_v53 = vld [vmem:[%s2152_s1 + $0x28] sm:$0x3]  ;;  %v223_v52 = vld [vmem:[%s2152_s1 + $0x38] sm:$0x3] }
  0x57   : > { %2175 = vst [vmem:[#allocation14_spill] sm:$0xff] %v1623_v57  ;;  %v1665_v15 = vrot.slane %v1475_v28, %v698_v39  ;;  %v437_v17 = vsub.s32 2, %v1446_v19  ;;  %v622_v24 = vsub.s32 5, %v1446_v19  ;;  %vm358_vm4 = vcmask 121856  }
  0x58   : > { %v1634_v60 = vsel %vm736_vm2, %v824_v36, %v826_v58  ;;  %v1685_v36 = vrot.slane %v1515_v41, %v469_v62  ;;  %vm957_vm5 = vcmask 130048  }
  0x59   : > { %324 = vrot.lane.b32.xlu1 %v1444_v14, %s1289_s25  ;;  %322 = vrot.lane.b32.xlu0 %v1434_v11, %s1289_s25  ;;  %2178 = vst [vmem:[#allocation17_spill] sm:$0xff] %v1634_v60  ;;  %v1737_v58 = vrot.slane %v1481_v30, %v622_v24 }
  0x5d   : > { %330 = vrot.lane.b32.xlu1 %v1441_v13, %s1289_s25  ;;  %328 = vrot.lane.b32.xlu0 %v1431_v10, %s1289_s25 }
  0x61   : > { %336 = vrot.lane.b32.xlu1 %v1453_v20, %s1289_s25  ;;  %334 = vrot.lane.b32.xlu0 %v1456_v21, %s1289_s25 }
  0x65   : > { %342 = vrot.lane.b32.xlu1 %v1467_v26, %s1289_s25  ;;  %340 = vrot.lane.b32.xlu0 %v1470_v27, %s1289_s25 }
  0x69   : > { %332 = vrot.lane.b32.xlu1 %v1493_v33, %s1289_s25  ;;  %326 = vrot.lane.b32.xlu0 %v1496_v34, %s1289_s25  ;;  %v1628_v33 = vsel %vm736_vm2, %v814_v51, %v816_v55  ;;  %v831_v34 = vrot.slane %v800_v31, 2  ;;  %v1724_v31 = vrot.slane %v1475_v28, %v622_v24 }
  0x6a   : > { %2176 = vst [vmem:[#allocation15_spill] sm:$0xff] %v1628_v33 }
  0x6b   : > { %v1631_v59 = vsel %vm736_vm2, %v829_v48, %v831_v34 }
  0x6c   : > { %2177 = vst [vmem:[#allocation16_spill] sm:$0xff] %v1631_v59 }
  0x6d   : > { %344 = vrot.lane.b32.xlu1 %v1519_v43, %s1289_s25  ;;  %338 = vrot.lane.b32.xlu0 %v1522_v44, %s1289_s25  ;;  %v1637_v43 = vsub.s32 1, %v1446_v19  ;;  %v373_v44 = vsub.s32 0, %v1446_v19  ;;  %v1700_v19 = vrot.slane %v1536_v54, %v469_v62  ;;  %s1205_s25 = sshll.u32 %s1290_s20, 4  ;;  %s1206_s25 = int_to_ptr.vmem [resolvable:$false] %s1205_s25 }
  0x6e   : > { %s1207_s26 = scalar_lea.vmem %s1206_s25, 2048  ;;  %p1208_p6 = scmp.lt.s32.totalorder %s2098_s5, %s1206_s25 }
  0x6f   : > { %v410_v51 = vrot.slane %v1481_v30, %v1637_v43  ;;  %v406_v1 = vrot.slane %v1475_v28, %v1637_v43  ;;  %v1647_v2 = vrot.slane %v1481_v30, %v373_v44  ;;  %v1656_v6 = vrot.slane %v1475_v28, %v373_v44  ;;  %p1209_p13 = scmp.lt.s32.totalorder %s1207_s26, %s1201_s19 }
  0x70   : > { %v414_v8 = vrot.slane %v1515_v41, %v1637_v43  ;;  %v418_v16 = vrot.slane %v1536_v54, %v1637_v43  ;;  %v1675_v23 = vrot.slane %v1515_v41, %v373_v44  ;;  %v1739_v62 = vrot.slane %v219_v25, %v373_v44 }
  0x71   : > { %v421_v9 = vmul.f32 %v410_v51, %v1431_v10  ;;  %v419_v18 = vmul.f32 %v406_v1, %v1434_v11  ;;  %v1672_v22 = vmul.f32 %v410_v51, %v1441_v13  ;;  %v217_v10 = vld [vmem:[%s2152_s1 + $0x8] sm:$0x3]  ;;  %v1682_v29 = vmul.f32 %v406_v1, %v1444_v14  ;;  %p1210_p2 = por %p1209_p13, %p1208_p6 }
  0x72   : > { %v1688_v11 = vrot.slane %v1515_v41, %v698_v39  ;;  %v1691_v13 = vrot.slane %v1536_v54, %v373_v44  ;;  %v1694_v37 = vmul.f32 %v414_v8, %v1453_v20  ;;  %v1697_v38 = vmul.f32 %v414_v8, %v1456_v21 }
  0x73   : > { %v1703_v14 = vrot.slane %v1536_v54, %v698_v39  ;;  %v1709_v48 = vmul.f32 %v418_v16, %v1467_v26  ;;  %v1712_v20 = vmul.f32 %v418_v16, %v1470_v27  ;;  %v1715_v21 = vrot.slane %v1475_v28, %v437_v17  ;;  %p1211_p5 = pnand %p1210_p2, %p1204_p0 }
  0x74   : > { %v1717_v49 = vrot.slane %v217_v10, %v373_v44  ;;  %v1727_v26 = vrot.slane %v217_v10, %v1637_v43  ;;  %v1730_v27 = vrot.slane %v1481_v30, %v437_v17  ;;  %v1742_v28 = vrot.slane %v1515_v41, %v437_v17 }
  0x75   : > { %v1749_v1 = vrot.slane %v1515_v41, %v622_v24  ;;  %v1751_v8 = vrot.slane %v221_v53, %v373_v44  ;;  %v1760_v60 = vrot.slane %v223_v52, %v373_v44  ;;  %v1770_v56 = vrot.slane %v219_v25, %v1637_v43 }
  0x76   : > { %2179 = vst [vmem:[#allocation18_spill] sm:$0xff] %v1727_v26 }
  0x77   : > { %2181 = vst [vmem:[#allocation20_spill] sm:$0xff] %v1760_v60  ;;  %2182 = vst [vmem:[#allocation21_spill] sm:$0xff] %v1770_v56 }
  0xb3   : > { %v280_v46 = vpop.permute.xlu1 %279  ;;  %v274_v47 = vpop.permute.xlu0 %273 }
  0xb4   : > { %v313_v55 = vsel %vm309_vm3, 0.0, %v280_v46  ;;  %v310_v34 = vsel %vm309_vm3, 0.0, %v274_v47  ;;  %v1755_v46 = vrot.slane %v1536_v54, %v437_v17  ;;  %v1758_v47 = vrot.slane %v1536_v54, %v622_v24 }
  0xb5   : > { %v389_v39 = vmul.f32 %v1647_v2, %v313_v55  ;;  %v1746_v51 = vmul.f32 %v1650_v4, %v313_v55  ;;  %v715_v16 = vmul.f32 %v1653_v5, %v313_v55  ;;  %v387_v59 = vmul.f32 %v1656_v6, %v310_v34 }
  0xb6   : > { %2180 = vst [vmem:[#allocation19_spill] sm:$0xff] %v1758_v47  ;;  %v483_v33 = vmul.f32 %v1659_v7, %v310_v34  ;;  %v1773_v17 = vrot.slane %v221_v53, %v1637_v43  ;;  %v1776_v54 = vrot.slane %v223_v52, %v1637_v43 }
  0xb7   : > { %v282_v10 = vpop.permute.xlu1 %281  ;;  %v276_v30 = vpop.permute.xlu0 %275  ;;  %v1778_v44 = vadd.f32 %v421_v9, %v389_v39  ;;  %v742_v45 = vrot.slane %v715_v16, 2  ;;  %v1792_v9 = vadd.f32 %v419_v18, %v387_v59 }
  0xb8   : > { %v314_v41 = vsel %vm309_vm3, 0.0, %v282_v10  ;;  %v311_v57 = vsel %vm309_vm3, 0.0, %v276_v30  ;;  %2183 = vst [vmem:[#allocation22_spill] sm:$0xff] %v1773_v17  ;;  %2184 = vst [vmem:[#allocation23_spill] sm:$0xff] %v1776_v54  ;;  %v712_v10 = vmul.f32 %v1665_v15, %v310_v34  ;;  %v508_v39 = vrot.slane %v483_v33, 1 }
  0xb9   : > { %v1767_v55 = vmul.f32 %v1653_v5, %v314_v41  ;;  %v1783_v30 = vmul.f32 %v1665_v15, %v311_v57  ;;  %v390_v50 = vmul.f32 %v1647_v2, %v314_v41  ;;  %v1787_v25 = vmul.f32 %v1650_v4, %v314_v41 }
  0xba   : > { %v1790_v53 = vmul.f32 %v1659_v7, %v311_v57  ;;  %v388_v16 = vmul.f32 %v1656_v6, %v311_v57  ;;  %v737_v17 = vrot.slane %v712_v10, 2 }
  0xbb   : > { %v288_v43 = vpop.permute.xlu1 %287  ;;  %v286_v52 = vpop.permute.xlu0 %285  ;;  %v1808_v18 = vadd.f32 %v1672_v22, %v390_v50  ;;  %v2186_v35 = vrot.slane %v1767_v55, 2 }
  0xbc   : > { %v317_v24 = vsel %vm309_vm3, 0.0, %v288_v43  ;;  %v316_v34 = vsel %vm309_vm3, 0.0, %v286_v52  ;;  %v514_v43 = vrot.slane %v1787_v25, 1  ;;  %v509_v57 = vrot.slane %v1790_v53, 1 }
  0xbd   : > { %v1800_v41 = vmul.f32 %v1688_v11, %v317_v24  ;;  %v392_v42 = vmul.f32 %v1675_v23, %v317_v24  ;;  %v1804_v59 = vmul.f32 %v1685_v36, %v317_v24  ;;  %v718_v33 = vmul.f32 %v1688_v11, %v316_v34 }
  0xbe   : > { %v391_v6 = vmul.f32 %v1675_v23, %v316_v34  ;;  %v489_v54 = vmul.f32 %v1685_v36, %v316_v34  ;;  %v1819_v50 = vsel %vm736_vm2, %v742_v45, %v2186_v35  ;;  %v1822_v22 = vadd.f32 %v1682_v29, %v388_v16 }
  0xbf   : > { %2185 = vst [vmem:[#allocation24_spill] sm:$0xff] %v1800_v41  ;;  %v294_v52 = vpop.permute.xlu1 %293  ;;  %v292_v2 = vpop.permute.xlu0 %291  ;;  %v2161_v10 = vrot.slane %v1800_v41, 2  ;;  %v747_v56 = vrot.slane %v718_v33, 2  ;;  %v2187_v25 = vrot.slane %v1783_v30, 2  ;;  %v1831_v34 = vadd.f32 %v1694_v37, %v392_v42 }
  0xc0   : > { %v320_v24 = vsel %vm309_vm3, 0.0, %v294_v52  ;;  %v319_v53 = vsel %vm309_vm3, 0.0, %v292_v2  ;;  %v1842_v2 = vsel %vm507_vm1, %v508_v39, %v509_v57  ;;  %v1845_v42 = vadd.f32 %v1697_v38, %v391_v6 }
  0xc1   : > { %v1827_v23 = vsel %vm736_vm2, %v737_v17, %v2187_v25  ;;  %v394_v52 = vmul.f32 %v1691_v13, %v320_v24  ;;  %v493_v35 = vmul.f32 %v1700_v19, %v320_v24  ;;  %v1837_v45 = vmul.f32 %v1703_v14, %v320_v24 }
  0xc2   : > { %v492_v29 = vmul.f32 %v1700_v19, %v319_v53  ;;  %v721_v17 = vmul.f32 %v1703_v14, %v319_v53  ;;  %v518_v37 = vrot.slane %v489_v54, 1  ;;  %v1850_v33 = vsel %vm736_vm2, %v747_v56, %v2161_v10 }
  0xc3   : > { %v284_v16 = vpop.permute.xlu1 %283  ;;  %v278_v25 = vpop.permute.xlu0 %277  ;;  %2188 = vst [vmem:[#allocation25_spill] sm:$0xff] %v1850_v33  ;;  %v393_v60 = vmul.f32 %v1691_v13, %v319_v53  ;;  %v1858_v26 = vadd.f32 %v1709_v48, %v394_v52  ;;  %v524_v38 = vrot.slane %v493_v35, 1  ;;  %v753_v56 = vrot.slane %v1837_v45, 2 }
  0xc4   : > { %v315_v24 = vsel %vm309_vm3, 0.0, %v284_v16  ;;  %v312_v39 = vsel %vm309_vm3, 0.0, %v278_v25  ;;  %v523_v10 = vrot.slane %v492_v29, 1  ;;  %v752_v16 = vrot.slane %v721_v17, 2 }
  0xc5   : > { %v488_v47 = vmul.f32 %v1650_v4, %v315_v24  ;;  %v717_v40 = vmul.f32 %v1653_v5, %v315_v24  ;;  %v485_v54 = vmul.f32 %v1659_v7, %v312_v39  ;;  %v714_v6 = vmul.f32 %v1665_v15, %v312_v39 }
  0xc6   : > { %v2189_v15 = vrot.slane %v1746_v51, 1  ;;  %v1871_v45 = vadd.f32 %v1712_v20, %v393_v60  ;;  %v2190_v29 = vrot.slane %v1804_v59, 1  ;;  %v1887_v60 = vsel %vm507_vm1, %v523_v10, %v524_v38 }
  0xc7   : > { %v516_v41 = vrot.slane %v488_v47, 1  ;;  %v296_v13 = vpop.permute.xlu1 %295  ;;  %v290_v53 = vpop.permute.xlu0 %289  ;;  %v745_v4 = vrot.slane %v717_v40, 2  ;;  %v511_v33 = vrot.slane %v485_v54, 1  ;;  %v740_v48 = vrot.slane %v714_v6, 2 }
  0xc8   : > { %v321_v5 = vsel %vm309_vm3, 0.0, %v296_v13  ;;  %v318_v25 = vsel %vm309_vm3, 0.0, %v290_v53  ;;  %v515_v35 = vsel %vm507_vm1, %v2189_v15, %v514_v43  ;;  %v1880_v17 = vsel %vm507_vm1, %v518_v37, %v2190_v29 }
  0xc9   : > { %v494_v52 = vmul.f32 %v1700_v19, %v321_v5  ;;  %v723_v7 = vmul.f32 %v1703_v14, %v321_v5  ;;  %v491_v47 = vmul.f32 %v1685_v36, %v318_v25  ;;  %v1875_v40 = vmul.f32 %v1688_v11, %v318_v25 }
  0xca   : > { %v1883_v19 = vsel %vm736_vm2, %v752_v16, %v753_v56  ;;  %v517_v14 = vsel %vm507_vm1, %v514_v43, %v516_v41  ;;  %v2191_v36 = vrot.slane %v1767_v55, 2  ;;  %v512_v20 = vsel %vm507_vm1, %v509_v57, %v511_v33 }
  0xcb   : > { %v526_v51 = vrot.slane %v494_v52, 1  ;;  %v325_v24 = vpop.permute.xlu1 %324  ;;  %v323_v39 = vpop.permute.xlu0 %322  ;;  %v2192_v6 = vrot.slane %v1783_v30, 2  ;;  %v755_v43 = vrot.slane %v723_v7, 2  ;;  %v521_v55 = vrot.slane %v491_v47, 1 }
  0xcc   : > { %v1892_v11 = vsel %vm736_vm2, %v2191_v36, %v745_v4  ;;  %v360_v37 = vsel %vm358_vm4, %v325_v24, 0.0  ;;  %v359_v54 = vsel %vm358_vm4, %v323_v39, 0.0  ;;  %v750_v13 = vrot.slane %v1875_v40, 2 }
  0xcd   : > { %v1900_v41 = vsel %vm736_vm2, %v2192_v6, %v740_v48  ;;  %v452_v10 = vmul.f32 %v1715_v21, %v360_v37  ;;  %v1904_v16 = vmul.f32 %v1724_v31, %v360_v37  ;;  %v1908_v57 = vmul.f32 %v1717_v49, %v360_v37 }
  0xce   : > { %v451_v33 = vmul.f32 %v1715_v21, %v359_v54  ;;  %v1912_v53 = vsel %vm507_vm1, %v524_v38, %v526_v51  ;;  %v636_v4 = vmul.f32 %v1724_v31, %v359_v54  ;;  %v865_v5 = vmul.f32 %v1717_v49, %v359_v54 }
  0xcf   : > { %v460_v30 = vadd.f32 %v452_v10, %v1822_v22  ;;  %v331_v25 = vpop.permute.xlu1 %330  ;;  %v329_v48 = vpop.permute.xlu0 %328  ;;  %v661_v52 = vrot.slane %v1904_v16, 1  ;;  %v1922_v21 = vsel %vm736_vm2, %v753_v56, %v755_v43  ;;  %v890_v51 = vrot.slane %v1908_v57, 2  ;;  %v2208_v57 = vld [vmem:[#allocation24_spill] sm:$0xff] }
  0xd0   : > { %v459_v7 = vadd.f32 %v451_v33, %v1792_v9  ;;  %v363_v15 = vsel %vm358_vm4, %v331_v25, 0.0  ;;  %v362_v47 = vsel %vm358_vm4, %v329_v48, 0.0  ;;  %v660_v29 = vrot.slane %v636_v4, 1 }
  0xd1   : > { %v537_v38 = vadd.f32 %v512_v20, %v460_v30  ;;  %v454_v22 = vmul.f32 %v1730_v27, %v363_v15  ;;  %v1928_v39 = vmul.f32 %v1737_v58, %v363_v15  ;;  %v453_v9 = vmul.f32 %v1730_v27, %v362_v47 }
  0xd2   : > { %v536_v24 = vadd.f32 %v1842_v2, %v459_v7  ;;  %v889_v37 = vrot.slane %v865_v5, 2  ;;  %v1936_v20 = vmul.f32 %v1739_v62, %v363_v15  ;;  %v662_v2 = vsel %vm507_vm1, %v660_v29, %v661_v52 }
  0xd3   : > { %v1932_v36 = vadd.f32 %v1543_v61, %v537_v38  ;;  %v462_v56 = vadd.f32 %v454_v22, %v1808_v18  ;;  %v337_v54 = vpop.permute.xlu1 %336  ;;  %v335_v6 = vpop.permute.xlu0 %334  ;;  %v666_v10 = vrot.slane %v1928_v39, 1  ;;  %v461_v27 = vadd.f32 %v453_v9, %v1778_v44 }
  0xd4   : > { %v612_v43 = vadd.f32 %v1552_v63, %v536_v24  ;;  %v639_v33 = vmul.f32 %v1737_v58, %v362_v47  ;;  %v868_v18 = vmul.f32 %v1739_v62, %v362_v47  ;;  %v366_v30 = vsel %vm358_vm4, %v337_v54, 0.0 }
  0xd5   : > { %v539_v61 = vadd.f32 %v517_v14, %v462_v56  ;;  %v2193_v4 = vrot.slane %v1804_v59, 1  ;;  %v538_v25 = vadd.f32 %v515_v35, %v461_v27  ;;  %v456_v48 = vmul.f32 %v1742_v28, %v366_v30 }
  0xd6   : > { %v688_v63 = vadd.f32 %v662_v2, %v612_v43  ;;  %v891_v44 = vsel %vm736_vm2, %v889_v37, %v890_v51  ;;  %v665_v7 = vrot.slane %v639_v33, 1  ;;  %v1958_v15 = vmul.f32 %v1749_v1, %v366_v30 }
  0xd7   : > { %v522_v5 = vsel %vm507_vm1, %v2193_v4, %v521_v55  ;;  %v1955_v14 = vadd.f32 %v1562_v3, %v539_v61  ;;  %v895_v55 = vrot.slane %v1936_v20, 2  ;;  %v614_v35 = vadd.f32 %v1568_v12, %v538_v25  ;;  %v343_v38 = vpop.permute.xlu1 %342  ;;  %v341_v9 = vpop.permute.xlu0 %340  ;;  %v2194_v4 = vld [vmem:[#allocation18_spill] sm:$0xff] }
  0xd8   : > { %v765_v59 = vadd.f32 %v1827_v23, %v688_v63  ;;  %v464_v47 = vadd.f32 %v456_v48, %v1831_v34  ;;  %v667_v29 = vsel %vm507_vm1, %v665_v7, %v666_v10  ;;  %v894_v22 = vrot.slane %v868_v18, 2  ;;  %v2195_v63 = vld [vmem:[#allocation9_spill] sm:$0xff]  ;;  %v2196_v7 = vld [vmem:[#allocation19_spill] sm:$0xff] }
  0xd9   : > { %v1968_v3 = vmul.f32 %v1751_v8, %v366_v30  ;;  %v365_v24 = vsel %vm358_vm4, %v335_v6, 0.0  ;;  %v690_v37 = vadd.f32 %v667_v29, %v614_v35  ;;  %v671_v34 = vrot.slane %v1958_v15, 1  ;;  %v2197_v35 = vld [vmem:[#allocation20_spill] sm:$0xff] }
  0xda   : > { %v841_v23 = vadd.f32 %v1557_v0, %v765_v59  ;;  %v541_v56 = vadd.f32 %v522_v5, %v464_v47  ;;  %v455_v12 = vmul.f32 %v1742_v28, %v365_v24  ;;  %v642_v54 = vmul.f32 %v1749_v1, %v365_v24 }
  0xdb   : > { %v871_v43 = vmul.f32 %v1751_v8, %v365_v24  ;;  %v369_v2 = vsel %vm358_vm4, %v343_v38, 0.0  ;;  %v767_v61 = vadd.f32 %v1819_v50, %v690_v37  ;;  %v896_v28 = vsel %vm736_vm2, %v894_v22, %v895_v55  ;;  %v333_v48 = vpop.permute.xlu1 %332  ;;  %v327_v38 = vpop.permute.xlu0 %326  ;;  %v2198_v24 = vld [vmem:[#allocation8_spill] sm:$0xff] }
  0xdc   : > { %v917_v27 = vadd.f32 %v891_v44, %v841_v23  ;;  %v1979_v6 = vadd.f32 %v1579_v32, %v541_v56  ;;  %v463_v0 = vadd.f32 %v455_v12, %v1845_v42  ;;  %v900_v33 = vrot.slane %v1968_v3, 2  ;;  %v2199_v12 = vld [vmem:[#allocation21_spill] sm:$0xff] }
  0xdd   : > { %v670_v18 = vrot.slane %v642_v54, 1  ;;  %v458_v30 = vmul.f32 %v1755_v46, %v369_v2  ;;  %v843_v25 = vadd.f32 %v2195_v63, %v767_v61  ;;  %v368_v32 = vsel %vm358_vm4, %v341_v9, 0.0 }
  0xde   : > { %v941_v5 = vadd.f32 %v2194_v4, %v917_v27  ;;  %v540_v50 = vadd.f32 %v1880_v17, %v463_v0  ;;  %v899_v42 = vrot.slane %v871_v43, 2  ;;  %v1993_v59 = vmul.f32 %v2196_v7, %v369_v2  ;;  %v2200_v27 = vld [vmem:[#allocation10_spill] sm:$0xff] }
  0xdf   : > { %v466_v44 = vadd.f32 %v458_v30, %v1858_v26  ;;  %v1996_v47 = vmul.f32 %v2197_v35, %v369_v2  ;;  %v919_v22 = vadd.f32 %v896_v28, %v843_v25  ;;  %v672_v17 = vsel %vm507_vm1, %v670_v18, %v671_v34  ;;  %v2201_v30 = vld [vmem:[#allocation25_spill] sm:$0xff] }
  0xe0   : > { %v949_v29 = vmax.f32 %v941_v5, 0.0  ;;  %v616_v23 = vadd.f32 %v2198_v24, %v540_v50  ;;  %v457_v37 = vmul.f32 %v1755_v46, %v368_v32  ;;  %v645_v26 = vmul.f32 %v2196_v7, %v368_v32  ;;  %v345_v50 = vpop.permute.xlu1 %344  ;;  %v2203_v24 = vld [vmem:[#allocation11_spill] sm:$0xff] }
  0xe1   : > { %v543_v9 = vadd.f32 %v1912_v53, %v466_v44  ;;  %v874_v56 = vmul.f32 %v2197_v35, %v368_v32  ;;  %v943_v54 = vadd.f32 %v2199_v12, %v919_v22  ;;  %v364_v2 = vsel %vm358_vm4, %v333_v48, 0.0 }
  0xe2   : > { %958 = vst.msk [vmem:[%s2008_s4] sm:$0xff] %vm957_vm5, %v949_v29  ;;  %v692_v43 = vadd.f32 %v672_v17, %v616_v23  ;;  %v361_v53 = vsel %vm358_vm4, %v327_v38, 0.0  ;;  %v676_v61 = vrot.slane %v1993_v59, 1  ;;  %v465_v0 = vadd.f32 %v457_v37, %v1871_v45  ;;  %v339_v45 = vpop.permute.xlu0 %338  ;;  %v2202_v38 = vld [vmem:[#allocation12_spill] sm:$0xff] }
  0xe3   : > { %v619_v46 = vadd.f32 %v2200_v27, %v543_v9  ;;  %v675_v28 = vrot.slane %v645_v26, 1  ;;  %v951_v18 = vmax.f32 %v943_v54, 0.0  ;;  %v641_v63 = vmul.f32 %v1737_v58, %v364_v2 }
  0xe4   : > { %v769_v5 = vadd.f32 %v2201_v30, %v692_v43  ;;  %v870_v25 = vmul.f32 %v1739_v62, %v364_v2  ;;  %v901_v32 = vsel %vm736_vm2, %v899_v42, %v900_v33  ;;  %v905_v48 = vrot.slane %v1996_v47, 2  ;;  %v2204_v43 = vld [vmem:[#allocation22_spill] sm:$0xff]  ;;  %v2205_v30 = vld [vmem:[#allocation13_spill] sm:$0xff] }
  0xe5   : > { %v542_v44 = vadd.f32 %v1887_v60, %v465_v0  ;;  %v638_v59 = vmul.f32 %v1724_v31, %v361_v53  ;;  %960 = vst.msk [vmem:[%s2008_s4 + $0x10] sm:$0xff] %vm957_vm5, %v951_v18  ;;  %v904_v22 = vrot.slane %v874_v56, 2  ;;  %v668_v58 = vrot.slane %v641_v63, 1 }
  0xe6   : > { %v845_v29 = vadd.f32 %v2202_v38, %v769_v5  ;;  %v867_v62 = vmul.f32 %v1717_v49, %v361_v53  ;;  %v677_v17 = vsel %vm507_vm1, %v675_v28, %v676_v61  ;;  %v370_v47 = vsel %vm358_vm4, %v345_v50, 0.0 }
  0xe7   : > { %v618_v23 = vadd.f32 %v2203_v24, %v542_v44  ;;  %v663_v42 = vrot.slane %v638_v59, 1  ;;  %v669_v31 = vsel %vm507_vm1, %v666_v10, %v668_v58  ;;  %v897_v60 = vrot.slane %v870_v25, 2 }
  0xe8   : > { %v921_v9 = vadd.f32 %v901_v32, %v845_v29  ;;  %v367_v37 = vsel %vm358_vm4, %v339_v45, 0.0  ;;  %v691_v56 = vadd.f32 %v669_v31, %v1955_v14  ;;  %v647_v54 = vmul.f32 %v2196_v7, %v370_v47 }
  0xe9   : > { %v694_v26 = vadd.f32 %v677_v17, %v618_v23  ;;  %v664_v49 = vsel %vm507_vm1, %v661_v52, %v663_v42  ;;  %v892_v39 = vrot.slane %v867_v62, 2  ;;  %v876_v10 = vmul.f32 %v2197_v35, %v370_v47  ;;  %v2212_v23 = vld [vmem:[#allocation17_spill] sm:$0xff] }
  0xea   : > { %v945_v2 = vadd.f32 %v2204_v43, %v921_v9  ;;  %v689_v53 = vadd.f32 %v664_v49, %v1932_v36  ;;  %v768_v0 = vadd.f32 %v1892_v11, %v691_v56  ;;  %v678_v28 = vrot.slane %v647_v54, 1  ;;  %v2206_v36 = vld [vmem:[#allocation14_spill] sm:$0xff] }
  0xeb   : > { %v771_v27 = vadd.f32 %v1883_v19, %v694_v26  ;;  %v644_v14 = vmul.f32 %v1749_v1, %v367_v37  ;;  %v906_v52 = vsel %vm736_vm2, %v904_v22, %v905_v48  ;;  %v873_v18 = vmul.f32 %v1751_v8, %v367_v37  ;;  %v2207_v19 = vld [vmem:[#allocation15_spill] sm:$0xff]  ;;  %v2211_v22 = vld [vmem:[#allocation16_spill] sm:$0xff] }
  0xec   : > { %v953_v16 = vmax.f32 %v945_v2, 0.0  ;;  %v766_v7 = vadd.f32 %v1900_v41, %v689_v53  ;;  %v844_v63 = vadd.f32 %v2206_v36, %v768_v0  ;;  %v679_v35 = vsel %vm507_vm1, %v676_v61, %v678_v28 }
  0xed   : > { %v847_v5 = vadd.f32 %v2205_v30, %v771_v27  ;;  %v673_v25 = vrot.slane %v644_v14, 1  ;;  %v898_v1 = vsel %vm736_vm2, %v895_v55, %v897_v60  ;;  %v893_v41 = vsel %vm736_vm2, %v890_v51, %v892_v39 }
  0xee   : > { %962 = vst.msk [vmem:[%s2008_s4 + $0x20] sm:$0xff] %vm957_vm5, %v953_v16  ;;  %v842_v11 = vadd.f32 %v2207_v19, %v766_v7  ;;  %v695_v8 = vadd.f32 %v679_v35, %v619_v46  ;;  %v920_v32 = vadd.f32 %v898_v1, %v844_v63  ;;  %v907_v44 = vrot.slane %v876_v10, 2  ;;  %v2210_v46 = vld [vmem:[#allocation23_spill] sm:$0xff] }
  0xef   : > { %v923_v50 = vadd.f32 %v906_v52, %v847_v5  ;;  %v674_v61 = vsel %vm507_vm1, %v671_v34, %v673_v25  ;;  %v2209_v45 = vrot.slane %v2208_v57, 2  ;;  %v902_v29 = vrot.slane %v873_v18, 2 }
  0xf0   : > { %v918_v59 = vadd.f32 %v893_v41, %v842_v11  ;;  %v772_v20 = vadd.f32 %v1922_v21, %v695_v8  ;;  %v693_v55 = vadd.f32 %v674_v61, %v1979_v6  ;;  %v944_v15 = vadd.f32 %v2199_v12, %v920_v32 }
  0xf1   : > { %v751_v51 = vsel %vm736_vm2, %v2209_v45, %v750_v13  ;;  %v947_v38 = vadd.f32 %v2210_v46, %v923_v50  ;;  %v908_v40 = vsel %vm736_vm2, %v905_v48, %v907_v44 }
  0xf2   : > { %v942_v34 = vadd.f32 %v2194_v4, %v918_v59  ;;  %v848_v21 = vadd.f32 %v2211_v22, %v772_v20  ;;  %v770_v58 = vadd.f32 %v751_v51, %v693_v55  ;;  %v952_v62 = vmax.f32 %v944_v15, 0.0 }
  0xf3   : > { %v955_v6 = vmax.f32 %v947_v38, 0.0  ;;  %v903_v4 = vsel %vm736_vm2, %v900_v33, %v902_v29 }
  0xf4   : > { %v950_v24 = vmax.f32 %v942_v34, 0.0  ;;  %v924_v13 = vadd.f32 %v908_v40, %v848_v21  ;;  %v846_v17 = vadd.f32 %v2212_v23, %v770_v58  ;;  %961 = vst.msk [vmem:[%s2008_s4 + $0x18] sm:$0xff] %vm957_vm5, %v952_v62 }
  0xf5   : > { %964 = vst.msk [vmem:[%s2008_s4 + $0x30] sm:$0xff] %vm957_vm5, %v955_v6 }
  0xf6   : > { %959 = vst.msk [vmem:[%s2008_s4 + $0x8] sm:$0xff] %vm957_vm5, %v950_v24  ;;  %v948_v12 = vadd.f32 %v2210_v46, %v924_v13  ;;  %v922_v48 = vadd.f32 %v903_v4, %v846_v17 }
  0xf8   : > { %v956_v42 = vmax.f32 %v948_v12, 0.0  ;;  %v946_v47 = vadd.f32 %v2204_v43, %v922_v48 }
  0xfa   : > { %965 = vst.msk [vmem:[%s2008_s4 + $0x38] sm:$0xff] %vm957_vm5, %v956_v42  ;;  %v954_v3 = vmax.f32 %v946_v47, 0.0 }
  0xfc   : > { %963 = vst.msk [vmem:[%s2008_s4 + $0x28] sm:$0xff] %vm957_vm5, %v954_v3 }
  0xfd   : > { %1214 = shalt.err (!%p1211_p5)
}
  0xfe   : > { %s1215_s27 = scalar_lea.hbm %s2096_s18, 1024  ;;  %s1219_s8 = scalar_lea.hbm %s2153_s2, 2048 }
  0xff   : > { %p1216_p4 = scmp.ne.s32.totalorder %s2096_s18, %s1215_s27  ;;  %p1220_p12 = scmp.lt.u32.totalorder %s2096_s18, %s2153_s2 }
 0x100   : > { %p1221_p1 = scmp.lt.u32.totalorder %s1219_s8, %s1215_s27  ;;  %p1223_p8 = scmp.lt.u32.totalorder %s1215_s27, %s2096_s18 }
 0x101   : > { %p1217_p7 = pnand %p1216_p4, %p2213_p9 }
 0x102   : > { %p1222_p3 = por %p1221_p1, %p1220_p12 }
 0x103   : > { %p1218_p10 = pneg %p1217_p7 }
 0x104   : > { %p1224_p11 = por %p1223_p8, %p1222_p3 }
 0x106   : > { %p1225_p0 = pnand %p1224_p11, %p1218_p10 }
 0x108   : > { %1228 = shalt.err (!%p1225_p0)
}
 0x109   : > { %s1291_s30 = smov 128   ;;  %s1292_s4 = smov 8  }
 0x10a   : > { %1105 = dma.vmem_to_hbm [thread:$0]  (%p2213_p9), %s2098_s5, 1024, %s2096_s18, %s967_s12, %s1291_s30, %s1291_s30, %s1292_s4  }
 0x10b PF: > { %s998_s7 = sand.u32 1, %s1263_s9   ;;  %p2214_p6 = scmp.ne.s32.totalorder %s2166_s24, 0 }
 0x10c   : > { %p2215_p13 = scmp.ge.s32.totalorder %s1283_s14, 2  ;;  %s999_s6 = scalar_lea.sflag [#allocation4], %s998_s7 }
 0x10e   : > { %p1112_p2 = pnand %p2215_p13, %p2214_p6 }
 0x110   : > { %1258 = dma.done.wait (!%p1112_p2), %s999_s6, 1024  }
 0x111   : > { %1260 = vsyncadd (!%p1112_p2), %s999_s6, 4294966272  ;;  %s18_s14 = sadd.s32 1, %s1283_s14   ;;  %s2216_s9 = smov %s1267_s10 }
 0x112   : > { %p15_p5 = scmp.ge.s32.totalorder %s18_s14, 4   ;;  %s2217_s10 = smov %s1271_s11 }
 0x113   : > { %s2218_s11 = smov %s1364_s23  ;;  %s2219_s12 = smov %s1279_s13 }
 0x114   : > { %s2220_s13 = smov %s2222_s17  ;;  %17 = sbr.rel (!%p15_p5) target bundleno = 6 (0x6), region = 76 }
 0x11b   :  { %1004 = vsyncpa [#allocation3], 1 }
 0x11c   :  { %1006 = vsyncpa [#allocation3 + $0x1], 1 }
 0x11d   :  { %1007 = vsyncpa [#allocation4], 1 }
 0x11e   :  { %1009 = vsyncpa [#allocation4 + $0x1], 1 }

</bundles_post_ra>
